<compile_context>
chip_gen: v7x
topology: tpu7x:2x2x1
jax: 0.10.0
libtpu: 0.0.40
codegen_flags: <defaults>
</compile_context>

<pallas_src>
import jax
import jax.numpy as jnp
from jax.experimental import pallas as pl
from jax.experimental.pallas import tpu as pltpu


# ----------------------------- Pallas kernels --------------------------------

def _conv_stats_kernel(p_ref, w_ref, y_ref, s1_ref, s2_ref):
    """y = bf16(p) @ W (f32 accum on MXU); emit per-tile sum / sum-of-squares."""
    y = jnp.dot(p_ref[...].astype(jnp.bfloat16), w_ref[...],
                preferred_element_type=jnp.float32)
    y_ref[...] = y
    c = y.shape[1]
    s1_ref[...] = jnp.sum(y, axis=0, keepdims=True).reshape(1, 1, c)
    s2_ref[...] = jnp.sum(y * y, axis=0, keepdims=True).reshape(1, 1, c)


def _normalize_kernel(y_ref, ss_ref, o_ref):
    """out = y * scale + shift (per-channel affine, lane-dense stores)."""
    o_ref[...] = y_ref[...] * ss_ref[0:1, :] + ss_ref[1:2, :]


# ------------------------------ wrapper ---------------------------------------

def _pick_tile(m, target):
    tm = min(target, m)
    while m % tm:
        tm //= 2
    return tm


def downsample_forward(x, params, eps=1e-5, tm=512):
    """Downsample.forward on a fully-occupied octree.

    x      : [N, Cin]  node features at depth d (octree node order), f32.
    params : {"w": [8*Cin, Cout], "b": [Cout], "gamma": [Cout], "beta": [Cout]}
    returns: [N/8, Cout] f32 node features at depth d-1 (conv + training-mode BN).
    """
    n, cin = x.shape
    assert n % 8 == 0, "node count must be a multiple of 8 (full sibling groups)"
    m = n // 8
    k = 8 * cin
    w = params["w"]
    assert w.shape[0] == k
    cout = w.shape[1]
    cout_pad = ((cout + 127) // 128) * 128

    # Kernel-[2]/stride-2 octree conv == contiguous-children gather == reshape.
    p = x.reshape(m, k)                      # stays f32; bf16 cast happens in-kernel

    # One-time, parameter-sized pads to a lane-dense (128-multiple) channel dim.
    w_bf = jnp.zeros((k, cout_pad), jnp.bfloat16).at[:, :cout].set(
        w.astype(jnp.bfloat16))
    gamma = jnp.zeros((cout_pad,), jnp.float32).at[:cout].set(
        params["gamma"].astype(jnp.float32))
    beta = jnp.zeros((cout_pad,), jnp.float32).at[:cout].set(
        params["beta"].astype(jnp.float32))
    # params["b"] intentionally unused: BN mean subtraction cancels it exactly.

    tm_eff = _pick_tile(m, tm)
    assert tm_eff == m or tm_eff % 8 == 0
    grid_m = m // tm_eff

    cparams = pltpu.CompilerParams(
        dimension_semantics=("parallel",),        # megacore sharding (v7x: 2 TCs)
        vmem_limit_bytes=32 * 1024 * 1024,        # explicit, safe on v5e/v6e/v7x
    )

    # ---- pass 1: conv + per-tile partial BN statistics (gridded over M) ----
    y, s1, s2 = pl.pallas_call(
        _conv_stats_kernel,
        grid=(grid_m,),
        in_specs=[
            pl.BlockSpec((tm_eff, k), lambda i: (i, 0)),       # activation tile
            pl.BlockSpec((k, cout_pad), lambda i: (0, 0)),     # W: DMA'd once, resident
        ],
        out_specs=(
            pl.BlockSpec((tm_eff, cout_pad), lambda i: (i, 0)),
            pl.BlockSpec((1, 1, cout_pad), lambda i: (i, 0, 0)),
            pl.BlockSpec((1, 1, cout_pad), lambda i: (i, 0, 0)),
        ),
        out_shape=(
            jax.ShapeDtypeStruct((m, cout_pad), jnp.float32),
            jax.ShapeDtypeStruct((grid_m, 1, cout_pad), jnp.float32),
            jax.ShapeDtypeStruct((grid_m, 1, cout_pad), jnp.float32),
        ),
        compiler_params=cparams,
        cost_estimate=pl.CostEstimate(
            flops=2 * m * k * cout_pad,
            transcendentals=0,
            bytes_accessed=4 * m * k + 2 * k * cout_pad + 4 * m * cout_pad,
        ),
    )(p, w_bf)

    # ---- tiny O(Cout) stat reduction + affine fold (plain XLA) ----
    total = jnp.sum(s1[:, 0, :], axis=0)
    total_sq = jnp.sum(s2[:, 0, :], axis=0)
    mean = total / m
    var = jnp.maximum(total_sq / m - mean * mean, 0.0)   # guard fp32 cancellation
    scale = gamma * jax.lax.rsqrt(var + eps)
    shift = beta - mean * scale
    ss = jnp.stack([scale, shift], axis=0)               # (2, Cout_pad)

    # ---- pass 2: normalize (gridded over M, lane-dense stores) ----
    out = pl.pallas_call(
        _normalize_kernel,
        grid=(grid_m,),
        in_specs=[
            pl.BlockSpec((tm_eff, cout_pad), lambda i: (i, 0)),
            pl.BlockSpec((2, cout_pad), lambda i: (0, 0)),
        ],
        out_specs=pl.BlockSpec((tm_eff, cout_pad), lambda i: (i, 0)),
        out_shape=jax.ShapeDtypeStruct((m, cout_pad), jnp.float32),
        compiler_params=cparams,
        cost_estimate=pl.CostEstimate(
            flops=2 * m * cout_pad,
            transcendentals=0,
            bytes_accessed=8 * m * cout_pad,
        ),
    )(y, ss)

    return out[:, :cout]


# ------------------------------ reference -------------------------------------

def downsample_reference(x, params, eps=1e-5):
    n, cin = x.shape
    m = n // 8
    y = x.reshape(m, 8 * cin) @ params["w"] + params["b"][None, :]
    mean = jnp.mean(y, axis=0, keepdims=True)
    var = jnp.mean((y - mean) ** 2, axis=0, keepdims=True)
    return (params["gamma"][None, :] * (y - mean) * jax.lax.rsqrt(var + eps)
            + params["beta"][None, :])


def init_downsample_params(key, in_channels, out_channels):
    kw, kb, kg, kbe = jax.random.split(key, 4)
    fan_in = 8 * in_channels
    w = jax.random.normal(kw, (fan_in, out_channels), jnp.float32)
    w = w * (1.0 / jnp.sqrt(jnp.float32(fan_in)))
    return {
        "w": w,
        "b": 0.1 * jax.random.normal(kb, (out_channels,), jnp.float32),
        "gamma": 1.0 + 0.1 * jax.random.normal(kg, (out_channels,), jnp.float32),
        "beta": 0.1 * jax.random.normal(kbe, (out_channels,), jnp.float32),
    }


# --------------------------------- main ----------------------------------------

if __name__ == "__main__":
    in_channels = 16
    out_channels = 32
    depth = 5                               # fully-occupied octree at depth 5
    n_nodes = (2 ** depth) ** 3             # 32768 leaf nodes, all non-empty

    key = jax.random.PRNGKey(0)
    k_param, k_data = jax.random.split(key)
    params = init_downsample_params(k_param, in_channels, out_channels)
    data = jax.random.normal(k_data, (n_nodes, in_channels), jnp.float32)

    fwd = jax.jit(downsample_forward)
    out = jax.block_until_ready(fwd(data, params))

    assert out.shape == (n_nodes // 8, out_channels), out.shape
    assert bool(jnp.all(jnp.isfinite(out)))

    ref = downsample_reference(data, params)
    max_err = float(jnp.max(jnp.abs(out - ref)))
    assert max_err < 5e-2, f"max abs err vs reference: {max_err}"

    print("KERNEL_OK")
</pallas_src>

<mosaic_0001>
module attributes {stable_mosaic.version = 11 : i64} {
  func.func @_conv_stats_kernel(%arg0: i32, %arg1: memref<512x128xf32, #tpu.memory_space<vmem>>, %arg2: memref<128x128xbf16, #tpu.memory_space<vmem>>, %arg3: memref<512x128xf32, #tpu.memory_space<vmem>>, %arg4: memref<1x1x128xf32, #tpu.memory_space<vmem>>, %arg5: memref<1x1x128xf32, #tpu.memory_space<vmem>>) attributes {dimension_semantics = [#tpu.dimension_semantics<parallel>], iteration_bounds = array<i64: 8>, scalar_prefetch = 0 : i64, scratch_operands = 0 : i64, tpu.core_type = #tpu.core_type<tc>, window_params = [{transform_indices = @transform_0, window_bounds = array<i64: 512, 128>}, {pipeline_mode = #tpu.pipeline_mode<synchronous>, transform_indices = @transform_1, window_bounds = array<i64: 128, 128>}, {transform_indices = @transform_2, window_bounds = array<i64: 512, 128>}, {transform_indices = @transform_3, window_bounds = array<i64: 1, 1, 128>}, {transform_indices = @transform_4, window_bounds = array<i64: 1, 1, 128>}]} {
    %c0 = arith.constant 0 : index
    %c0_0 = arith.constant 0 : index
    %0 = vector.load %arg1[%c0, %c0_0] : memref<512x128xf32, #tpu.memory_space<vmem>>, vector<512x128xf32>
    %1 = arith.truncf %0 : vector<512x128xf32> to vector<512x128xbf16>
    %c0_1 = arith.constant 0 : index
    %c0_2 = arith.constant 0 : index
    %2 = vector.load %arg2[%c0_1, %c0_2] : memref<128x128xbf16, #tpu.memory_space<vmem>>, vector<128x128xbf16>
    %cst = arith.constant dense<0.000000e+00> : vector<512x128xf32>
    %3 = tpu.matmul %1, %2, %cst {dimension_numbers = #tpu.dot_dimension_numbers<[1], [0], [0], [1], [0, 0, 1, 1], [], []>} : vector<512x128xbf16>, vector<128x128xbf16>, vector<512x128xf32> -> vector<512x128xf32>
    %c0_3 = arith.constant 0 : index
    %c0_4 = arith.constant 0 : index
    %4 = vector.load %arg3[%c0_3, %c0_4] : memref<512x128xf32, #tpu.memory_space<vmem>>, vector<512x128xf32>
    tpu.vector_store %arg3[%c0_3, %c0_4], %3 {strides = array<i32>} : memref<512x128xf32, #tpu.memory_space<vmem>>, vector<512x128xf32>,
    %cst_5 = arith.constant dense<0.000000e+00> : vector<128xf32>
    %5 = vector.multi_reduction <add>, %3, %cst_5 [0] : vector<512x128xf32> to vector<128xf32>
    %6 = vector.shape_cast %5 : vector<128xf32> to vector<1x128xf32>
    %7 = vector.shape_cast %6 : vector<1x128xf32> to vector<1x1x128xf32>
    %c0_6 = arith.constant 0 : index
    %c0_7 = arith.constant 0 : index
    %c0_8 = arith.constant 0 : index
    %8 = vector.load %arg4[%c0_6, %c0_7, %c0_8] : memref<1x1x128xf32, #tpu.memory_space<vmem>>, vector<1x1x128xf32>
    tpu.vector_store %arg4[%c0_6, %c0_7, %c0_8], %7 {strides = array<i32>} : memref<1x1x128xf32, #tpu.memory_space<vmem>>, vector<1x1x128xf32>,
    %9 = arith.mulf %3, %3 : vector<512x128xf32>
    %cst_9 = arith.constant dense<0.000000e+00> : vector<128xf32>
    %10 = vector.multi_reduction <add>, %9, %cst_9 [0] : vector<512x128xf32> to vector<128xf32>
    %11 = vector.shape_cast %10 : vector<128xf32> to vector<1x128xf32>
    %12 = vector.shape_cast %11 : vector<1x128xf32> to vector<1x1x128xf32>
    %c0_10 = arith.constant 0 : index
    %c0_11 = arith.constant 0 : index
    %c0_12 = arith.constant 0 : index
    %13 = vector.load %arg5[%c0_10, %c0_11, %c0_12] : memref<1x1x128xf32, #tpu.memory_space<vmem>>, vector<1x1x128xf32>
    tpu.vector_store %arg5[%c0_10, %c0_11, %c0_12], %12 {strides = array<i32>} : memref<1x1x128xf32, #tpu.memory_space<vmem>>, vector<1x1x128xf32>,
    return
  }
  func.func @transform_0(%arg0: i32) -> (i32, i32) {
    %c0_i32 = arith.constant 0 : i32
    %c0_i32_0 = arith.constant 0 : i32
    return %arg0, %c0_i32 : i32, i32
  }
  func.func @transform_1(%arg0: i32) -> (i32, i32) {
    %c0_i32 = arith.constant 0 : i32
    %c0_i32_0 = arith.constant 0 : i32
    %c0_i32_1 = arith.constant 0 : i32
    return %c0_i32, %c0_i32_0 : i32, i32
  }
  func.func @transform_2(%arg0: i32) -> (i32, i32) {
    %c0_i32 = arith.constant 0 : i32
    %c0_i32_0 = arith.constant 0 : i32
    return %arg0, %c0_i32 : i32, i32
  }
  func.func @transform_3(%arg0: i32) -> (i32, i32, i32) {
    %c0_i32 = arith.constant 0 : i32
    %c0_i32_0 = arith.constant 0 : i32
    %c0_i32_1 = arith.constant 0 : i32
    return %arg0, %c0_i32, %c0_i32_0 : i32, i32, i32
  }
  func.func @transform_4(%arg0: i32) -> (i32, i32, i32) {
    %c0_i32 = arith.constant 0 : i32
    %c0_i32_0 = arith.constant 0 : i32
    %c0_i32_1 = arith.constant 0 : i32
    return %arg0, %c0_i32, %c0_i32_0 : i32, i32, i32
  }
}

module attributes {stable_mosaic.version = 11 : i64} {
  func.func @_normalize_kernel(%arg0: i32, %arg1: memref<512x128xf32, #tpu.memory_space<vmem>>, %arg2: memref<2x128xf32, #tpu.memory_space<vmem>>, %arg3: memref<512x128xf32, #tpu.memory_space<vmem>>) attributes {dimension_semantics = [#tpu.dimension_semantics<parallel>], iteration_bounds = array<i64: 8>, scalar_prefetch = 0 : i64, scratch_operands = 0 : i64, tpu.core_type = #tpu.core_type<tc>, window_params = [{transform_indices = @transform_0, window_bounds = array<i64: 512, 128>}, {pipeline_mode = #tpu.pipeline_mode<synchronous>, transform_indices = @transform_1, window_bounds = array<i64: 2, 128>}, {transform_indices = @transform_2, window_bounds = array<i64: 512, 128>}]} {
    %c0 = arith.constant 0 : index
    %c0_0 = arith.constant 0 : index
    %0 = vector.load %arg1[%c0, %c0_0] : memref<512x128xf32, #tpu.memory_space<vmem>>, vector<512x128xf32>
    %c0_1 = arith.constant 0 : index
    %c0_2 = arith.constant 0 : index
    %1 = vector.load %arg2[%c0_1, %c0_2] : memref<2x128xf32, #tpu.memory_space<vmem>>, vector<1x128xf32>
    %2 = vector.broadcast %1 : vector<1x128xf32> to vector<512x128xf32>
    %3 = arith.mulf %0, %2 : vector<512x128xf32>
    %c1 = arith.constant 1 : index
    %c0_3 = arith.constant 0 : index
    %4 = vector.load %arg2[%c1, %c0_3] : memref<2x128xf32, #tpu.memory_space<vmem>>, vector<1x128xf32>
    %5 = vector.broadcast %4 : vector<1x128xf32> to vector<512x128xf32>
    %6 = arith.addf %3, %5 : vector<512x128xf32>
    %c0_4 = arith.constant 0 : index
    %c0_5 = arith.constant 0 : index
    %7 = vector.load %arg3[%c0_4, %c0_5] : memref<512x128xf32, #tpu.memory_space<vmem>>, vector<512x128xf32>
    tpu.vector_store %arg3[%c0_4, %c0_5], %6 {strides = array<i32>} : memref<512x128xf32, #tpu.memory_space<vmem>>, vector<512x128xf32>,
    return
  }
  func.func @transform_0(%arg0: i32) -> (i32, i32) {
    %c0_i32 = arith.constant 0 : i32
    %c0_i32_0 = arith.constant 0 : i32
    return %arg0, %c0_i32 : i32, i32
  }
  func.func @transform_1(%arg0: i32) -> (i32, i32) {
    %c0_i32 = arith.constant 0 : i32
    %c0_i32_0 = arith.constant 0 : i32
    %c0_i32_1 = arith.constant 0 : i32
    return %c0_i32, %c0_i32_0 : i32, i32
  }
  func.func @transform_2(%arg0: i32) -> (i32, i32) {
    %c0_i32 = arith.constant 0 : i32
    %c0_i32_0 = arith.constant 0 : i32
    return %arg0, %c0_i32 : i32, i32
  }
}

</mosaic_0001>

<bundles_post_ra>
// kernel: downsample_forward.3
= control target key start
LH: loop header
LB: loop body
LE: loop exit
PB: predicated region body
PF: predicated region fallthrough
CT: control target
= control target key end

     0   :  { %s513_s9 = smov 0   ;;  %s800_s0 = inlined_call_operand.vmem [shape: f32[4096,128], index: 0, kind: input, shape index: {}]   ;;  %s801_s1 = inlined_call_operand.vmem [shape: f32[2,128], index: 1, kind: input, shape index: {}]   ;;  %s802_s2 = inlined_call_operand.vmem [shape: f32[4096,128], index: 2, kind: output, shape index: {}]  }
   0x1 LB: > { %s469_s10 = sadd.s32 4294967295, %s496_s9   ;;  %p473_p0 = scmp.ge.s32.totalorder %s496_s9, 1  ;;  %s496_s9 = sphi %s513_s9, %s12_s9  }
   0x2   : > { %p113_p1 = scmp.lt.s32.totalorder %s496_s9, 9 }
   0x4   : > { %p114_p2 = pnand %p473_p0, %p113_p1 }
   0x5   : > { %s474_s11 = sshll.u32 (!%p114_p2), %s469_s10, 6  ;;  %v524_v0 = vld [vmem:[%s801_s1] ss:$0 sm:$0xff] (!%p114_p2)  ;;  %v534_v1 = vld [vmem:[%s801_s1 + $0x1] ss:$0 sm:$0xff] (!%p114_p2) }
   0x6   : > { %117 = sbr.rel (%p114_p2) target bundleno = 59 (0x3b), region = 28  ;;  %p136_p3 = scmp.lt.s32.totalorder (!%p114_p2), %s474_s11, 511 }
   0xd   : > { %s804_s11 = smov (!%p136_p3, %s474_s11), 511 }
   0xe   : > { %s475_s12 = sshll.u32 %s804_s11, 3 }
   0xf   : > { %s529_s17 = scalar_lea.vmem %s800_s0, %s475_s12  ;;  %s548_s22 = scalar_lea.vmem %s802_s2, %s475_s12 }
  0x10   : > { %v147_v2 = vld [vmem:[%s529_s17] sm:$0xff]  ;;  %v148_v3 = vld [vmem:[%s529_s17 + $0x8] sm:$0xff]  ;;  %v149_v4 = vld [vmem:[%s529_s17 + $0x10] sm:$0xff] }
  0x11   : > { %v216_v5 = vmul.f32 %v524_v0, %v147_v2  ;;  %v217_v6 = vmul.f32 %v524_v0, %v148_v3  ;;  %v218_v7 = vmul.f32 %v524_v0, %v149_v4  ;;  %v150_v8 = vld [vmem:[%s529_s17 + $0x18] sm:$0xff]  ;;  %v151_v9 = vld [vmem:[%s529_s17 + $0x20] sm:$0xff]  ;;  %v152_v10 = vld [vmem:[%s529_s17 + $0x28] sm:$0xff] }
  0x12   : > { %v219_v11 = vmul.f32 %v524_v0, %v150_v8  ;;  %v220_v12 = vmul.f32 %v524_v0, %v151_v9  ;;  %v221_v13 = vmul.f32 %v524_v0, %v152_v10  ;;  %v153_v14 = vld [vmem:[%s529_s17 + $0x30] sm:$0xff]  ;;  %v154_v15 = vld [vmem:[%s529_s17 + $0x38] sm:$0xff]  ;;  %v155_v16 = vld [vmem:[%s529_s17 + $0x40] sm:$0xff] }
  0x13   : > { %v285_v17 = vadd.f32 %v534_v1, %v216_v5  ;;  %v286_v18 = vadd.f32 %v534_v1, %v217_v6  ;;  %v287_v19 = vadd.f32 %v534_v1, %v218_v7  ;;  %v222_v20 = vmul.f32 %v524_v0, %v153_v14  ;;  %v156_v21 = vld [vmem:[%s529_s17 + $0x48] sm:$0xff]  ;;  %v157_v22 = vld [vmem:[%s529_s17 + $0x50] sm:$0xff]  ;;  %v158_v23 = vld [vmem:[%s529_s17 + $0x58] sm:$0xff] }
  0x14   : > { %v288_v24 = vadd.f32 %v534_v1, %v219_v11  ;;  %v289_v25 = vadd.f32 %v534_v1, %v220_v12  ;;  %v290_v26 = vadd.f32 %v534_v1, %v221_v13  ;;  %v223_v27 = vmul.f32 %v524_v0, %v154_v15  ;;  %v159_v28 = vld [vmem:[%s529_s17 + $0x60] sm:$0xff]  ;;  %v160_v29 = vld [vmem:[%s529_s17 + $0x68] sm:$0xff]  ;;  %v161_v30 = vld [vmem:[%s529_s17 + $0x70] sm:$0xff] }
  0x15   : > { %349 = vst [vmem:[%s548_s22] sm:$0xff] %v285_v17  ;;  %350 = vst [vmem:[%s548_s22 + $0x8] sm:$0xff] %v286_v18  ;;  %v291_v31 = vadd.f32 %v534_v1, %v222_v20  ;;  %v224_v32 = vmul.f32 %v524_v0, %v155_v16  ;;  %v225_v33 = vmul.f32 %v524_v0, %v156_v21  ;;  %v162_v35 = vld [vmem:[%s529_s17 + $0x78] sm:$0xff]  ;;  %v163_v40 = vld [vmem:[%s529_s17 + $0x80] sm:$0xff] }
  0x16   : > { %351 = vst [vmem:[%s548_s22 + $0x10] sm:$0xff] %v287_v19  ;;  %v226_v34 = vmul.f32 %v524_v0, %v157_v22  ;;  %352 = vst [vmem:[%s548_s22 + $0x18] sm:$0xff] %v288_v24  ;;  %v292_v36 = vadd.f32 %v534_v1, %v223_v27  ;;  %v227_v37 = vmul.f32 %v524_v0, %v158_v23  ;;  %v164_v41 = vld [vmem:[%s529_s17 + $0x88] sm:$0xff]  ;;  %v165_v42 = vld [vmem:[%s529_s17 + $0x90] sm:$0xff] }
  0x17   : > { %353 = vst [vmem:[%s548_s22 + $0x20] sm:$0xff] %v289_v25  ;;  %354 = vst [vmem:[%s548_s22 + $0x28] sm:$0xff] %v290_v26  ;;  %v228_v38 = vmul.f32 %v524_v0, %v159_v28  ;;  %v229_v39 = vmul.f32 %v524_v0, %v160_v29  ;;  %v293_v43 = vadd.f32 %v534_v1, %v224_v32  ;;  %v166_v47 = vld [vmem:[%s529_s17 + $0x98] sm:$0xff]  ;;  %v167_v48 = vld [vmem:[%s529_s17 + $0xa0] sm:$0xff] }
  0x18   : > { %355 = vst [vmem:[%s548_s22 + $0x30] sm:$0xff] %v291_v31  ;;  %v294_v44 = vadd.f32 %v534_v1, %v225_v33  ;;  %v295_v45 = vadd.f32 %v534_v1, %v226_v34  ;;  %v230_v46 = vmul.f32 %v524_v0, %v161_v30  ;;  %v168_v49 = vld [vmem:[%s529_s17 + $0xa8] sm:$0xff]  ;;  %356 = vst [vmem:[%s548_s22 + $0x38] sm:$0xff] %v292_v36  ;;  %v169_v54 = vld [vmem:[%s529_s17 + $0xb0] sm:$0xff] }
  0x19   : > { %v296_v50 = vadd.f32 %v534_v1, %v227_v37  ;;  %v297_v51 = vadd.f32 %v534_v1, %v228_v38  ;;  %v298_v52 = vadd.f32 %v534_v1, %v229_v39  ;;  %v231_v53 = vmul.f32 %v524_v0, %v162_v35  ;;  %357 = vst [vmem:[%s548_s22 + $0x40] sm:$0xff] %v293_v43  ;;  %v170_v59 = vld [vmem:[%s529_s17 + $0xb8] sm:$0xff]  ;;  %v171_v2 = vld [vmem:[%s529_s17 + $0xc0] sm:$0xff]  ;;  %v172_v3 = vld [vmem:[%s529_s17 + $0xc8] sm:$0xff] }
  0x1a   : > { %358 = vst [vmem:[%s548_s22 + $0x48] sm:$0xff] %v294_v44  ;;  %359 = vst [vmem:[%s548_s22 + $0x50] sm:$0xff] %v295_v45  ;;  %v299_v55 = vadd.f32 %v534_v1, %v230_v46  ;;  %v232_v56 = vmul.f32 %v524_v0, %v163_v40  ;;  %v233_v57 = vmul.f32 %v524_v0, %v164_v41  ;;  %v173_v4 = vld [vmem:[%s529_s17 + $0xd0] sm:$0xff]  ;;  %v174_v9 = vld [vmem:[%s529_s17 + $0xd8] sm:$0xff] }
  0x1b   : > { %v234_v58 = vmul.f32 %v524_v0, %v165_v42  ;;  %360 = vst [vmem:[%s548_s22 + $0x58] sm:$0xff] %v296_v50  ;;  %361 = vst [vmem:[%s548_s22 + $0x60] sm:$0xff] %v297_v51  ;;  %v300_v60 = vadd.f32 %v534_v1, %v231_v53  ;;  %v235_v61 = vmul.f32 %v524_v0, %v166_v47  ;;  %v175_v10 = vld [vmem:[%s529_s17 + $0xe0] sm:$0xff]  ;;  %v176_v11 = vld [vmem:[%s529_s17 + $0xe8] sm:$0xff] }
  0x1c   : > { %362 = vst [vmem:[%s548_s22 + $0x68] sm:$0xff] %v298_v52  ;;  %v236_v62 = vmul.f32 %v524_v0, %v167_v48  ;;  %v237_v63 = vmul.f32 %v524_v0, %v168_v49  ;;  %363 = vst [vmem:[%s548_s22 + $0x70] sm:$0xff] %v299_v55  ;;  %v301_v5 = vadd.f32 %v534_v1, %v232_v56  ;;  %v177_v16 = vld [vmem:[%s529_s17 + $0xf0] sm:$0xff]  ;;  %v178_v21 = vld [vmem:[%s529_s17 + $0xf8] sm:$0xff] }
  0x1d   : > { %v302_v6 = vadd.f32 %v534_v1, %v233_v57  ;;  %v303_v7 = vadd.f32 %v534_v1, %v234_v58  ;;  %v238_v8 = vmul.f32 %v524_v0, %v169_v54  ;;  %364 = vst [vmem:[%s548_s22 + $0x78] sm:$0xff] %v300_v60  ;;  %v304_v12 = vadd.f32 %v534_v1, %v235_v61  ;;  %v179_v26 = vld [vmem:[%s529_s17 + $0x100] sm:$0xff]  ;;  %v180_v27 = vld [vmem:[%s529_s17 + $0x108] sm:$0xff]  ;;  %v181_v28 = vld [vmem:[%s529_s17 + $0x110] sm:$0xff] }
  0x1e   : > { %v305_v13 = vadd.f32 %v534_v1, %v236_v62  ;;  %v306_v14 = vadd.f32 %v534_v1, %v237_v63  ;;  %v239_v15 = vmul.f32 %v524_v0, %v170_v59  ;;  %365 = vst [vmem:[%s548_s22 + $0x80] sm:$0xff] %v301_v5  ;;  %v240_v18 = vmul.f32 %v524_v0, %v171_v2  ;;  %v182_v33 = vld [vmem:[%s529_s17 + $0x118] sm:$0xff]  ;;  %v183_v34 = vld [vmem:[%s529_s17 + $0x120] sm:$0xff]  ;;  %v184_v35 = vld [vmem:[%s529_s17 + $0x128] sm:$0xff] }
  0x1f   : > { %366 = vst [vmem:[%s548_s22 + $0x88] sm:$0xff] %v302_v6  ;;  %367 = vst [vmem:[%s548_s22 + $0x90] sm:$0xff] %v303_v7  ;;  %v307_v17 = vadd.f32 %v534_v1, %v238_v8  ;;  %v241_v19 = vmul.f32 %v524_v0, %v172_v3  ;;  %v242_v20 = vmul.f32 %v524_v0, %v173_v4  ;;  %v185_v40 = vld [vmem:[%s529_s17 + $0x130] sm:$0xff]  ;;  %v186_v45 = vld [vmem:[%s529_s17 + $0x138] sm:$0xff] }
  0x20   : > { %368 = vst [vmem:[%s548_s22 + $0x98] sm:$0xff] %v304_v12  ;;  %369 = vst [vmem:[%s548_s22 + $0xa0] sm:$0xff] %v305_v13  ;;  %v308_v22 = vadd.f32 %v534_v1, %v239_v15  ;;  %v243_v23 = vmul.f32 %v524_v0, %v174_v9  ;;  %v244_v24 = vmul.f32 %v524_v0, %v175_v10  ;;  %v187_v50 = vld [vmem:[%s529_s17 + $0x140] sm:$0xff]  ;;  %v188_v51 = vld [vmem:[%s529_s17 + $0x148] sm:$0xff] }
  0x21   : > { %370 = vst [vmem:[%s548_s22 + $0xa8] sm:$0xff] %v306_v14  ;;  %v245_v25 = vmul.f32 %v524_v0, %v176_v11  ;;  %371 = vst [vmem:[%s548_s22 + $0xb0] sm:$0xff] %v307_v17  ;;  %v309_v29 = vadd.f32 %v534_v1, %v240_v18  ;;  %v310_v30 = vadd.f32 %v534_v1, %v241_v19  ;;  %v189_v52 = vld [vmem:[%s529_s17 + $0x150] sm:$0xff]  ;;  %v190_v57 = vld [vmem:[%s529_s17 + $0x158] sm:$0xff] }
  0x22   : > { %v311_v31 = vadd.f32 %v534_v1, %v242_v20  ;;  %v246_v32 = vmul.f32 %v524_v0, %v177_v16  ;;  %372 = vst [vmem:[%s548_s22 + $0xb8] sm:$0xff] %v308_v22  ;;  %v312_v36 = vadd.f32 %v534_v1, %v243_v23  ;;  %v313_v37 = vadd.f32 %v534_v1, %v244_v24  ;;  %v191_v58 = vld [vmem:[%s529_s17 + $0x160] sm:$0xff]  ;;  %v192_v59 = vld [vmem:[%s529_s17 + $0x168] sm:$0xff]  ;;  %v193_v2 = vld [vmem:[%s529_s17 + $0x170] sm:$0xff] }
  0x23   : > { %v314_v38 = vadd.f32 %v534_v1, %v245_v25  ;;  %v247_v39 = vmul.f32 %v524_v0, %v178_v21  ;;  %373 = vst [vmem:[%s548_s22 + $0xc0] sm:$0xff] %v309_v29  ;;  %374 = vst [vmem:[%s548_s22 + $0xc8] sm:$0xff] %v310_v30  ;;  %v248_v42 = vmul.f32 %v524_v0, %v179_v26  ;;  %v194_v7 = vld [vmem:[%s529_s17 + $0x178] sm:$0xff]  ;;  %v195_v12 = vld [vmem:[%s529_s17 + $0x180] sm:$0xff] }
  0x24   : > { %375 = vst [vmem:[%s548_s22 + $0xd0] sm:$0xff] %v311_v31  ;;  %v315_v41 = vadd.f32 %v534_v1, %v246_v32  ;;  %v249_v43 = vmul.f32 %v524_v0, %v180_v27  ;;  %v250_v44 = vmul.f32 %v524_v0, %v181_v28  ;;  %376 = vst [vmem:[%s548_s22 + $0xd8] sm:$0xff] %v312_v36  ;;  %v196_v13 = vld [vmem:[%s529_s17 + $0x188] sm:$0xff]  ;;  %v197_v14 = vld [vmem:[%s529_s17 + $0x190] sm:$0xff] }
  0x25   : > { %377 = vst [vmem:[%s548_s22 + $0xe0] sm:$0xff] %v313_v37  ;;  %378 = vst [vmem:[%s548_s22 + $0xe8] sm:$0xff] %v314_v38  ;;  %v316_v46 = vadd.f32 %v534_v1, %v247_v39  ;;  %v251_v47 = vmul.f32 %v524_v0, %v182_v33  ;;  %v252_v48 = vmul.f32 %v524_v0, %v183_v34  ;;  %v198_v19 = vld [vmem:[%s529_s17 + $0x198] sm:$0xff]  ;;  %v199_v20 = vld [vmem:[%s529_s17 + $0x1a0] sm:$0xff] }
  0x26   : > { %v253_v49 = vmul.f32 %v524_v0, %v184_v35  ;;  %379 = vst [vmem:[%s548_s22 + $0xf0] sm:$0xff] %v315_v41  ;;  %v317_v53 = vadd.f32 %v534_v1, %v248_v42  ;;  %v318_v54 = vadd.f32 %v534_v1, %v249_v43  ;;  %v319_v55 = vadd.f32 %v534_v1, %v250_v44  ;;  %v200_v21 = vld [vmem:[%s529_s17 + $0x1a8] sm:$0xff]  ;;  %v201_v26 = vld [vmem:[%s529_s17 + $0x1b0] sm:$0xff]  ;;  %v202_v31 = vld [vmem:[%s529_s17 + $0x1b8] sm:$0xff] }
  0x27   : > { %v254_v56 = vmul.f32 %v524_v0, %v185_v40  ;;  %380 = vst [vmem:[%s548_s22 + $0xf8] sm:$0xff] %v316_v46  ;;  %v320_v60 = vadd.f32 %v534_v1, %v251_v47  ;;  %v321_v61 = vadd.f32 %v534_v1, %v252_v48  ;;  %v255_v63 = vmul.f32 %v524_v0, %v186_v45  ;;  %v203_v36 = vld [vmem:[%s529_s17 + $0x1c0] sm:$0xff]  ;;  %v204_v37 = vld [vmem:[%s529_s17 + $0x1c8] sm:$0xff]  ;;  %v205_v38 = vld [vmem:[%s529_s17 + $0x1d0] sm:$0xff] }
  0x28   : > { %v322_v62 = vadd.f32 %v534_v1, %v253_v49  ;;  %381 = vst [vmem:[%s548_s22 + $0x100] sm:$0xff] %v317_v53  ;;  %382 = vst [vmem:[%s548_s22 + $0x108] sm:$0xff] %v318_v54  ;;  %v256_v4 = vmul.f32 %v524_v0, %v187_v50  ;;  %v257_v5 = vmul.f32 %v524_v0, %v188_v51  ;;  %v206_v43 = vld [vmem:[%s529_s17 + $0x1d8] sm:$0xff]  ;;  %v207_v44 = vld [vmem:[%s529_s17 + $0x1e0] sm:$0xff] }
  0x29   : > { %383 = vst [vmem:[%s548_s22 + $0x110] sm:$0xff] %v319_v55  ;;  %v323_v3 = vadd.f32 %v534_v1, %v254_v56  ;;  %v258_v6 = vmul.f32 %v524_v0, %v189_v52  ;;  %384 = vst [vmem:[%s548_s22 + $0x118] sm:$0xff] %v320_v60  ;;  %v324_v8 = vadd.f32 %v534_v1, %v255_v63  ;;  %v208_v45 = vld [vmem:[%s529_s17 + $0x1e8] sm:$0xff]  ;;  %v209_v50 = vld [vmem:[%s529_s17 + $0x1f0] sm:$0xff] }
  0x2a   : > { %385 = vst [vmem:[%s548_s22 + $0x120] sm:$0xff] %v321_v61  ;;  %386 = vst [vmem:[%s548_s22 + $0x128] sm:$0xff] %v322_v62  ;;  %v259_v9 = vmul.f32 %v524_v0, %v190_v57  ;;  %v260_v10 = vmul.f32 %v524_v0, %v191_v58  ;;  %v261_v11 = vmul.f32 %v524_v0, %v192_v59  ;;  %v210_v55 = vld [vmem:[%s529_s17 + $0x1f8] sm:$0xff] }
  0x2b   : > { %387 = vst [vmem:[%s548_s22 + $0x130] sm:$0xff] %v323_v3  ;;  %v325_v15 = vadd.f32 %v534_v1, %v256_v4  ;;  %v326_v16 = vadd.f32 %v534_v1, %v257_v5  ;;  %v327_v17 = vadd.f32 %v534_v1, %v258_v6  ;;  %v262_v18 = vmul.f32 %v524_v0, %v193_v2 }
  0x2c   : > { %388 = vst [vmem:[%s548_s22 + $0x138] sm:$0xff] %v324_v8  ;;  %v328_v22 = vadd.f32 %v534_v1, %v259_v9  ;;  %v329_v23 = vadd.f32 %v534_v1, %v260_v10  ;;  %v330_v24 = vadd.f32 %v534_v1, %v261_v11  ;;  %v263_v25 = vmul.f32 %v524_v0, %v194_v7 }
  0x2d   : > { %389 = vst [vmem:[%s548_s22 + $0x140] sm:$0xff] %v325_v15  ;;  %390 = vst [vmem:[%s548_s22 + $0x148] sm:$0xff] %v326_v16  ;;  %v331_v27 = vadd.f32 %v534_v1, %v262_v18  ;;  %v264_v28 = vmul.f32 %v524_v0, %v195_v12  ;;  %v265_v29 = vmul.f32 %v524_v0, %v196_v13 }
  0x2e   : > { %391 = vst [vmem:[%s548_s22 + $0x150] sm:$0xff] %v327_v17  ;;  %v266_v30 = vmul.f32 %v524_v0, %v197_v14  ;;  %392 = vst [vmem:[%s548_s22 + $0x158] sm:$0xff] %v328_v22  ;;  %v332_v32 = vadd.f32 %v534_v1, %v263_v25  ;;  %v267_v33 = vmul.f32 %v524_v0, %v198_v19 }
  0x2f   : > { %393 = vst [vmem:[%s548_s22 + $0x160] sm:$0xff] %v329_v23  ;;  %394 = vst [vmem:[%s548_s22 + $0x168] sm:$0xff] %v330_v24  ;;  %v268_v34 = vmul.f32 %v524_v0, %v199_v20  ;;  %v269_v35 = vmul.f32 %v524_v0, %v200_v21  ;;  %v333_v39 = vadd.f32 %v534_v1, %v264_v28 }
  0x30   : > { %395 = vst [vmem:[%s548_s22 + $0x170] sm:$0xff] %v331_v27  ;;  %v334_v40 = vadd.f32 %v534_v1, %v265_v29  ;;  %v335_v41 = vadd.f32 %v534_v1, %v266_v30  ;;  %v270_v42 = vmul.f32 %v524_v0, %v201_v26  ;;  %396 = vst [vmem:[%s548_s22 + $0x178] sm:$0xff] %v332_v32 }
  0x31   : > { %v336_v46 = vadd.f32 %v534_v1, %v267_v33  ;;  %v337_v47 = vadd.f32 %v534_v1, %v268_v34  ;;  %v338_v48 = vadd.f32 %v534_v1, %v269_v35  ;;  %v271_v49 = vmul.f32 %v524_v0, %v202_v31  ;;  %397 = vst [vmem:[%s548_s22 + $0x180] sm:$0xff] %v333_v39 }
  0x32   : > { %398 = vst [vmem:[%s548_s22 + $0x188] sm:$0xff] %v334_v40  ;;  %399 = vst [vmem:[%s548_s22 + $0x190] sm:$0xff] %v335_v41  ;;  %v339_v51 = vadd.f32 %v534_v1, %v270_v42  ;;  %v272_v52 = vmul.f32 %v524_v0, %v203_v36  ;;  %v273_v53 = vmul.f32 %v524_v0, %v204_v37 }
  0x33   : > { %v274_v54 = vmul.f32 %v524_v0, %v205_v38  ;;  %400 = vst [vmem:[%s548_s22 + $0x198] sm:$0xff] %v336_v46  ;;  %401 = vst [vmem:[%s548_s22 + $0x1a0] sm:$0xff] %v337_v47  ;;  %v340_v56 = vadd.f32 %v534_v1, %v271_v49  ;;  %v275_v57 = vmul.f32 %v524_v0, %v206_v43 }
  0x34   : > { %402 = vst [vmem:[%s548_s22 + $0x1a8] sm:$0xff] %v338_v48  ;;  %v276_v58 = vmul.f32 %v524_v0, %v207_v44  ;;  %v277_v59 = vmul.f32 %v524_v0, %v208_v45  ;;  %403 = vst [vmem:[%s548_s22 + $0x1b0] sm:$0xff] %v339_v51  ;;  %v341_v60 = vadd.f32 %v534_v1, %v272_v52 }
  0x35   : > { %v342_v61 = vadd.f32 %v534_v1, %v273_v53  ;;  %v343_v62 = vadd.f32 %v534_v1, %v274_v54  ;;  %v278_v63 = vmul.f32 %v524_v0, %v209_v50  ;;  %404 = vst [vmem:[%s548_s22 + $0x1b8] sm:$0xff] %v340_v56  ;;  %v344_v2 = vadd.f32 %v534_v1, %v275_v57 }
  0x36   : > { %v345_v3 = vadd.f32 %v534_v1, %v276_v58  ;;  %v346_v4 = vadd.f32 %v534_v1, %v277_v59  ;;  %v279_v5 = vmul.f32 %v524_v0, %v210_v55  ;;  %405 = vst [vmem:[%s548_s22 + $0x1c0] sm:$0xff] %v341_v60 }
  0x37   : > { %406 = vst [vmem:[%s548_s22 + $0x1c8] sm:$0xff] %v342_v61  ;;  %407 = vst [vmem:[%s548_s22 + $0x1d0] sm:$0xff] %v343_v62  ;;  %v347_v6 = vadd.f32 %v534_v1, %v278_v63 }
  0x38   : > { %408 = vst [vmem:[%s548_s22 + $0x1d8] sm:$0xff] %v344_v2  ;;  %409 = vst [vmem:[%s548_s22 + $0x1e0] sm:$0xff] %v345_v3  ;;  %v348_v7 = vadd.f32 %v534_v1, %v279_v5 }
  0x39   : > { %410 = vst [vmem:[%s548_s22 + $0x1e8] sm:$0xff] %v346_v4  ;;  %411 = vst [vmem:[%s548_s22 + $0x1f0] sm:$0xff] %v347_v6 }
  0x3a   : > { %412 = vst [vmem:[%s548_s22 + $0x1f8] sm:$0xff] %v348_v7 }
  0x3b PF: > { %s12_s9 = sadd.s32 1, %s496_s9  }
  0x3c   : > { %p9_p4 = scmp.ge.s32.totalorder %s12_s9, 10  }
  0x3e   :  { %11 = sbr.rel (!%p9_p4) target bundleno = 1 (0x1), region = 58 }

// kernel: downsample_forward.2
= control target key start
LH: loop header
LB: loop body
LE: loop exit
PB: predicated region body
PF: predicated region fallthrough
CT: control target
= control target key end

     0   :  { %s1246_s15 = smov 0   ;;  %s1629_s0 = inlined_call_operand.vmem [shape: f32[4096,128], index: 0, kind: input, shape index: {}]   ;;  %s1630_s1 = inlined_call_operand.vmem [shape: bf16[128,128], index: 1, kind: input, shape index: {}]   ;;  %s1631_s2 = inlined_call_operand.vmem [shape: f32[4096,128], index: 2, kind: output, shape index: {0}]   ;;  %s1632_s3 = inlined_call_operand.vmem [shape: f32[8,1,128], index: 3, kind: output, shape index: {1}]   ;;  %s1633_s4 = inlined_call_operand.vmem [shape: f32[8,1,128], index: 4, kind: output, shape index: {2}]  }
   0x1 LB: > { %s1252_s16 = sadd.s32 4294967295, %s1219_s15   ;;  %p1046_p0 = scmp.ge.s32.totalorder %s1219_s15, 1  ;;  %s1219_s15 = sphi %s1246_s15, %s15_s15  }
   0x2   : > { %p168_p1 = scmp.lt.s32.totalorder %s1219_s15, 9 }
   0x4   : > { %p169_p2 = pnand %p1046_p0, %p168_p1 }
   0x5   : > { %v1205_v0 = vld [vmem:[%s1630_s1] sm:$0xff] (!%p169_p2)   ;;  %s1047_s19 = sshll.u32 (!%p169_p2), %s1252_s16, 6  ;;  %v1206_v1 = vld [vmem:[%s1630_s1 + $0x8] sm:$0xff] (!%p169_p2)   ;;  %v1207_v2 = vld [vmem:[%s1630_s1 + $0x10] sm:$0xff] (!%p169_p2)   ;;  %p212_p4 = scmp.lt.s32.totalorder (!%p169_p2), %s1252_s16, 7 }
   0x6   : > { %172 = sbr.rel (%p169_p2) target bundleno = 394 (0x18a), region = 28  ;;  %p201_p3 = scmp.lt.s32.totalorder (!%p169_p2), %s1047_s19, 511  ;;  %1101 = vmatprep.subr.bf16.mxu0 (!%p169_p2), %v1205_v0  ;;  %1181 = vmatprep.subr.bf16.mxu1 (!%p169_p2), %v1205_v0  ;;  %v1208_v3 = vld [vmem:[%s1630_s1 + $0x18] sm:$0xff] (!%p169_p2)   ;;  %v1209_v7 = vld [vmem:[%s1630_s1 + $0x20] sm:$0xff] (!%p169_p2)   ;;  %v1210_v8 = vld [vmem:[%s1630_s1 + $0x28] sm:$0xff] (!%p169_p2)  }
   0x7   : > { %1102 = vmatpush3.bf16.msra.mxu0 (!%p169_p2), %v1205_v0  ;;  %1189 = vmatpush3.bf16.msra.mxu1 (!%p169_p2), %v1205_v0  ;;  %v1211_v11 = vld [vmem:[%s1630_s1 + $0x30] sm:$0xff] (!%p169_p2)   ;;  %v1212_v13 = vld [vmem:[%s1630_s1 + $0x38] sm:$0xff] (!%p169_p2)  }
   0x8   : > { %1103 = vmatprep.subr.bf16.mxu0 (!%p169_p2), %v1206_v1  ;;  %1182 = vmatprep.subr.bf16.mxu1 (!%p169_p2), %v1206_v1 }
   0xb   : > { %1104 = vmatpush3.bf16.msra.mxu0 (!%p169_p2), %v1206_v1  ;;  %1190 = vmatpush3.bf16.msra.mxu1 (!%p169_p2), %v1206_v1 }
   0xc   : > { %1105 = vmatprep.subr.bf16.mxu0 (!%p169_p2), %v1207_v2  ;;  %1183 = vmatprep.subr.bf16.mxu1 (!%p169_p2), %v1207_v2 }
   0xd   : > { %s1635_s19 = smov (!%p201_p3, %s1047_s19), 511  ;;  %s1637_s16 = smov (!%p212_p4, %s1252_s16), 7 }
   0xe   : > { %s1048_s24 = sshll.u32 %s1635_s19, 3  ;;  %s214_s19 = scalar_lea.vmem %s1632_s3, %s1637_s16 }
   0xf   : > { %s1274_s27 = scalar_lea.vmem %s1629_s0, %s1048_s24  ;;  %1106 = vmatpush3.bf16.msra.mxu0 %v1207_v2  ;;  %1191 = vmatpush3.bf16.msra.mxu1 %v1207_v2  ;;  %s1360_s14 = scalar_lea.vmem %s1631_s2, %s1048_s24 }
  0x10   : > { %v219_v4 = vld [vmem:[%s1274_s27] sm:$0xff]  ;;  %v220_v5 = vld [vmem:[%s1274_s27 + $0x8] sm:$0xff]  ;;  %1107 = vmatprep.subr.bf16.mxu0 %v1208_v3  ;;  %1184 = vmatprep.subr.bf16.mxu1 %v1208_v3  ;;  %v221_v14 = vld [vmem:[%s1274_s27 + $0x10] sm:$0xff]  ;;  %s217_s22 = scalar_lea.vmem %s1633_s4, %s1637_s16 }
  0x11   : > { %v283_v6 = vpack.c.bf16 %v220_v5, %v219_v4  ;;  %v251_v9 = vld [vmem:[%s1274_s27 + $0x100] sm:$0xff]  ;;  %v252_v10 = vld [vmem:[%s1274_s27 + $0x108] sm:$0xff]  ;;  %v222_v15 = vld [vmem:[%s1274_s27 + $0x18] sm:$0xff] }
  0x12   : > { %v299_v12 = vpack.c.bf16 %v252_v10, %v251_v9  ;;  %v223_v16 = vld [vmem:[%s1274_s27 + $0x20] sm:$0xff]  ;;  %v224_v17 = vld [vmem:[%s1274_s27 + $0x28] sm:$0xff]  ;;  %v253_v18 = vld [vmem:[%s1274_s27 + $0x110] sm:$0xff]  ;;  %v284_v22 = vpack.c.bf16 %v222_v15, %v221_v14 }
  0x13   : > { %1117 = vmatprep.mubr.bf16.mxu0 %v283_v6  ;;  %1108 = vmatpush3.bf16.msra.mxu0 %v1208_v3  ;;  %v254_v19 = vld [vmem:[%s1274_s27 + $0x118] sm:$0xff]  ;;  %v255_v20 = vld [vmem:[%s1274_s27 + $0x120] sm:$0xff]  ;;  %v256_v21 = vld [vmem:[%s1274_s27 + $0x128] sm:$0xff]  ;;  %v285_v23 = vpack.c.bf16 %v224_v17, %v223_v16 }
  0x14   : > { %1109 = vmatprep.subr.bf16.mxu0 %v1209_v7  ;;  %1192 = vmatpush3.bf16.msra.mxu1 %v1208_v3  ;;  %v300_v24 = vpack.c.bf16 %v254_v19, %v253_v18  ;;  %v301_v25 = vpack.c.bf16 %v256_v21, %v255_v20  ;;  %v225_v26 = vld [vmem:[%s1274_s27 + $0x30] sm:$0xff]  ;;  %v226_v27 = vld [vmem:[%s1274_s27 + $0x38] sm:$0xff]  ;;  %v227_v28 = vld [vmem:[%s1274_s27 + $0x40] sm:$0xff] }
  0x15   : > { %1185 = vmatprep.subr.bf16.mxu1 %v1209_v7  ;;  %1149 = vmatprep.mubr.bf16.mxu1 %v299_v12  ;;  %v228_v29 = vld [vmem:[%s1274_s27 + $0x48] sm:$0xff]  ;;  %v257_v30 = vld [vmem:[%s1274_s27 + $0x130] sm:$0xff]  ;;  %v258_v31 = vld [vmem:[%s1274_s27 + $0x138] sm:$0xff]  ;;  %v286_v34 = vpack.c.bf16 %v226_v27, %v225_v26 }
  0x16   : > { %v259_v32 = vld [vmem:[%s1274_s27 + $0x140] sm:$0xff]  ;;  %v260_v33 = vld [vmem:[%s1274_s27 + $0x148] sm:$0xff]  ;;  %v287_v35 = vpack.c.bf16 %v228_v29, %v227_v28  ;;  %v302_v36 = vpack.c.bf16 %v258_v31, %v257_v30  ;;  %v229_v38 = vld [vmem:[%s1274_s27 + $0x50] sm:$0xff] }
  0x17   : > { %1110 = vmatpush3.bf16.msra.mxu0 %v1209_v7  ;;  %v303_v37 = vpack.c.bf16 %v260_v33, %v259_v32  ;;  %v230_v39 = vld [vmem:[%s1274_s27 + $0x58] sm:$0xff]  ;;  %v231_v40 = vld [vmem:[%s1274_s27 + $0x60] sm:$0xff]  ;;  %v232_v41 = vld [vmem:[%s1274_s27 + $0x68] sm:$0xff] }
  0x18   : > { %1111 = vmatprep.subr.bf16.mxu0 %v1210_v8  ;;  %1193 = vmatpush3.bf16.msra.mxu1 %v1209_v7  ;;  %v261_v42 = vld [vmem:[%s1274_s27 + $0x150] sm:$0xff]  ;;  %v262_v43 = vld [vmem:[%s1274_s27 + $0x158] sm:$0xff]  ;;  %v263_v44 = vld [vmem:[%s1274_s27 + $0x160] sm:$0xff]  ;;  %v288_v46 = vpack.c.bf16 %v230_v39, %v229_v38  ;;  %v289_v47 = vpack.c.bf16 %v232_v41, %v231_v40 }
  0x19   : > { %1186 = vmatprep.subr.bf16.mxu1 %v1210_v8  ;;  %v264_v45 = vld [vmem:[%s1274_s27 + $0x168] sm:$0xff]  ;;  %v304_v48 = vpack.c.bf16 %v262_v43, %v261_v42  ;;  %v233_v50 = vld [vmem:[%s1274_s27 + $0x70] sm:$0xff]  ;;  %v234_v51 = vld [vmem:[%s1274_s27 + $0x78] sm:$0xff] }
  0x1a   : > { %v305_v49 = vpack.c.bf16 %v264_v45, %v263_v44  ;;  %v235_v52 = vld [vmem:[%s1274_s27 + $0x80] sm:$0xff]  ;;  %v236_v53 = vld [vmem:[%s1274_s27 + $0x88] sm:$0xff]  ;;  %v265_v54 = vld [vmem:[%s1274_s27 + $0x170] sm:$0xff]  ;;  %v290_v58 = vpack.c.bf16 %v234_v51, %v233_v50 }
  0x1b   : > { %1112 = vmatpush3.bf16.msra.mxu0 %v1210_v8  ;;  %v266_v55 = vld [vmem:[%s1274_s27 + $0x178] sm:$0xff]  ;;  %v267_v56 = vld [vmem:[%s1274_s27 + $0x180] sm:$0xff]  ;;  %v268_v57 = vld [vmem:[%s1274_s27 + $0x188] sm:$0xff]  ;;  %v291_v59 = vpack.c.bf16 %v236_v53, %v235_v52 }
  0x1c   : > { %1113 = vmatprep.subr.bf16.mxu0 %v1211_v11  ;;  %1194 = vmatpush3.bf16.msra.mxu1 %v1210_v8  ;;  %v306_v60 = vpack.c.bf16 %v266_v55, %v265_v54  ;;  %v307_v61 = vpack.c.bf16 %v268_v57, %v267_v56  ;;  %v237_v62 = vld [vmem:[%s1274_s27 + $0x90] sm:$0xff]  ;;  %v238_v63 = vld [vmem:[%s1274_s27 + $0x98] sm:$0xff]  ;;  %v239_v0 = vld [vmem:[%s1274_s27 + $0xa0] sm:$0xff] }
  0x1d   : > { %1187 = vmatprep.subr.bf16.mxu1 %v1211_v11  ;;  %v240_v1 = vld [vmem:[%s1274_s27 + $0xa8] sm:$0xff]  ;;  %v269_v2 = vld [vmem:[%s1274_s27 + $0x190] sm:$0xff]  ;;  %v270_v3 = vld [vmem:[%s1274_s27 + $0x198] sm:$0xff]  ;;  %v292_v6 = vpack.c.bf16 %v238_v63, %v237_v62 }
  0x1e   : > { %v271_v4 = vld [vmem:[%s1274_s27 + $0x1a0] sm:$0xff]  ;;  %v272_v5 = vld [vmem:[%s1274_s27 + $0x1a8] sm:$0xff]  ;;  %v293_v7 = vpack.c.bf16 %v240_v1, %v239_v0  ;;  %v308_v8 = vpack.c.bf16 %v270_v3, %v269_v2  ;;  %v241_v10 = vld [vmem:[%s1274_s27 + $0xb0] sm:$0xff] }
  0x1f   : > { %1114 = vmatpush3.bf16.msra.mxu0 %v1211_v11  ;;  %v309_v9 = vpack.c.bf16 %v272_v5, %v271_v4  ;;  %v243_v12 = vld [vmem:[%s1274_s27 + $0xc0] sm:$0xff]  ;;  %v273_v14 = vld [vmem:[%s1274_s27 + $0x1b0] sm:$0xff]  ;;  %v274_v15 = vld [vmem:[%s1274_s27 + $0x1b8] sm:$0xff] }
  0x20   : > { %1115 = vmatprep.subr.bf16.mxu0 %v1212_v13  ;;  %1195 = vmatpush3.bf16.msra.mxu1 %v1211_v11  ;;  %v242_v11 = vld [vmem:[%s1274_s27 + $0xb8] sm:$0xff]  ;;  %v275_v16 = vld [vmem:[%s1274_s27 + $0x1c0] sm:$0xff]  ;;  %v276_v17 = vld [vmem:[%s1274_s27 + $0x1c8] sm:$0xff]  ;;  %v310_v20 = vpack.c.bf16 %v274_v15, %v273_v14 }
  0x21   : > { %1188 = vmatprep.subr.bf16.mxu1 %v1212_v13  ;;  %v294_v18 = vpack.c.bf16 %v242_v11, %v241_v10  ;;  %v311_v21 = vpack.c.bf16 %v276_v17, %v275_v16  ;;  %v277_v26 = vld [vmem:[%s1274_s27 + $0x1d0] sm:$0xff]  ;;  %v278_v27 = vld [vmem:[%s1274_s27 + $0x1d8] sm:$0xff]  ;;  %v279_v28 = vld [vmem:[%s1274_s27 + $0x1e0] sm:$0xff] }
  0x22   : > { %v280_v29 = vld [vmem:[%s1274_s27 + $0x1e8] sm:$0xff]  ;;  %v312_v32 = vpack.c.bf16 %v278_v27, %v277_v26 }
  0x23   : > { %1116 = vmatpush3.bf16.msra.mxu0 %v1212_v13  ;;  %v313_v33 = vpack.c.bf16 %v280_v29, %v279_v28 }
  0x24   : > { %1196 = vmatpush3.bf16.msra.mxu1 %v1212_v13  ;;  %v244_v13 = vld [vmem:[%s1274_s27 + $0xc8] sm:$0xff] }
  0x25   : > { %v295_v19 = vpack.c.bf16 %v244_v13, %v243_v12 }
  0x26   : > { %1118 = vmatmul.mubr.bf16.vlgmr.msra.gmra.mrb[0].mxu0 %v284_v22  ;;  %v245_v22 = vld [vmem:[%s1274_s27 + $0xd0] sm:$0xff] }
  0x27   : > { %1121 = vmatprep.mubr.bf16.mxu0 %v285_v23  ;;  %1150 = vmatmul.mubr.bf16.vlgmr.msra.gmra.mrb[0].mxu1 %v300_v24  ;;  %v246_v23 = vld [vmem:[%s1274_s27 + $0xd8] sm:$0xff]  ;;  %v247_v24 = vld [vmem:[%s1274_s27 + $0xe0] sm:$0xff] }
  0x28   : > { %1153 = vmatprep.mubr.bf16.mxu1 %v301_v25  ;;  %v248_v25 = vld [vmem:[%s1274_s27 + $0xe8] sm:$0xff]  ;;  %v296_v30 = vpack.c.bf16 %v246_v23, %v245_v22 }
  0x29   : > { %v297_v31 = vpack.c.bf16 %v248_v25, %v247_v24 }
  0x2e   : > { %1122 = vmatmul.mubr.bf16.gmra.mrb[4].mxu0 %v286_v34  ;;  %v249_v34 = vld [vmem:[%s1274_s27 + $0xf0] sm:$0xff] }
  0x2f   : > { %1125 = vmatprep.mubr.bf16.mxu0 %v287_v35  ;;  %1154 = vmatmul.mubr.bf16.gmra.mrb[4].mxu1 %v302_v36  ;;  %v250_v35 = vld [vmem:[%s1274_s27 + $0xf8] sm:$0xff]  ;;  %v281_v36 = vld [vmem:[%s1274_s27 + $0x1f0] sm:$0xff] }
  0x30   : > { %1157 = vmatprep.mubr.bf16.mxu1 %v303_v37  ;;  %v282_v37 = vld [vmem:[%s1274_s27 + $0x1f8] sm:$0xff]  ;;  %v298_v38 = vpack.c.bf16 %v250_v35, %v249_v34 }
  0x31   : > { %v314_v39 = vpack.c.bf16 %v282_v37, %v281_v36 }
  0x36   : > { %1126 = vmatmul.mubr.bf16.gmra.mrb[8].mxu0 %v288_v46 }
  0x37   : > { %1129 = vmatprep.mubr.bf16.mxu0 %v289_v47  ;;  %1158 = vmatmul.mubr.bf16.gmra.mrb[8].mxu1 %v304_v48 }
  0x38   : > { %1161 = vmatprep.mubr.bf16.mxu1 %v305_v49 }
  0x3e   : > { %1130 = vmatmul.mubr.bf16.gmra.mrb[12].mxu0 %v290_v58 }
  0x3f   : > { %1133 = vmatprep.mubr.bf16.mxu0 %v291_v59  ;;  %1162 = vmatmul.mubr.bf16.gmra.mrb[12].mxu1 %v306_v60 }
  0x40   : > { %1165 = vmatprep.mubr.bf16.mxu1 %v307_v61 }
  0x46   : > { %1134 = vmatmul.mubr.bf16.gmra.mrb[16].mxu0 %v292_v6 }
  0x47   : > { %1137 = vmatprep.mubr.bf16.mxu0 %v293_v7  ;;  %1166 = vmatmul.mubr.bf16.gmra.mrb[16].mxu1 %v308_v8 }
  0x48   : > { %1169 = vmatprep.mubr.bf16.mxu1 %v309_v9 }
  0x4e   : > { %1138 = vmatmul.mubr.bf16.gmra.mrb[20].mxu0 %v294_v18 }
  0x4f   : > { %1141 = vmatprep.mubr.bf16.mxu0 %v295_v19  ;;  %1170 = vmatmul.mubr.bf16.gmra.mrb[20].mxu1 %v310_v20 }
  0x50   : > { %1173 = vmatprep.mubr.bf16.mxu1 %v311_v21 }
  0x56   : > { %1142 = vmatmul.mubr.bf16.gmra.mrb[24].mxu0 %v296_v30 }
  0x57   : > { %1145 = vmatprep.mubr.bf16.mxu0 %v297_v31  ;;  %1174 = vmatmul.mubr.bf16.gmra.mrb[24].mxu1 %v312_v32 }
  0x58   : > { %1177 = vmatprep.mubr.bf16.mxu1 %v313_v33 }
  0x5e   : > { %1146 = vmatmul.mubr.bf16.gmra.mrb[28].mxu0 %v298_v38 }
  0x5f   : > { %1178 = vmatmul.mubr.bf16.gmra.mrb[28].mxu1 %v314_v39 }
  0xf9   : > { %v1119_v40 = vpop.f32.mrb[0].mxu0 }
  0xfa   : > { %670 = vst [vmem:[%s1360_s14 + $0x10] sm:$0xff] %v1119_v40  ;;  %v413_v41 = vpop.f32.mrb[1].mxu0  ;;  %v1363_v42 = vpop.f32.mrb[0].mxu1  ;;  %v804_v51 = vmul.f32 %v1119_v40, %v1119_v40 }
  0xfb   : > { %668 = vst [vmem:[%s1360_s14] sm:$0xff] %v413_v41  ;;  %v1120_v43 = vpop.f32.mrb[2].mxu0  ;;  %702 = vst [vmem:[%s1360_s14 + $0x110] sm:$0xff] %v1363_v42  ;;  %v1368_v44 = vpop.f32.mrb[1].mxu1  ;;  %v802_v47 = vmul.f32 %v413_v41, %v413_v41 }
  0xfc   : > { %671 = vst [vmem:[%s1360_s14 + $0x18] sm:$0xff] %v1120_v43  ;;  %v416_v45 = vpop.f32.mrb[3].mxu0  ;;  %700 = vst [vmem:[%s1360_s14 + $0x100] sm:$0xff] %v1368_v44  ;;  %v1373_v46 = vpop.f32.mrb[2].mxu1  ;;  %v805_v54 = vmul.f32 %v1120_v43, %v1120_v43 }
  0xfd   : > { %669 = vst [vmem:[%s1360_s14 + $0x8] sm:$0xff] %v416_v45  ;;  %v732_v48 = vadd.f32 %v416_v45, %v413_v41  ;;  %v803_v49 = vmul.f32 %v416_v45, %v416_v45  ;;  %703 = vst [vmem:[%s1360_s14 + $0x118] sm:$0xff] %v1373_v46  ;;  %v1378_v50 = vpop.f32.mrb[3].mxu1 }
  0xfe   : > { %701 = vst [vmem:[%s1360_s14 + $0x108] sm:$0xff] %v1378_v50 }
  0xff   : > { %v733_v52 = vadd.f32 %v1119_v40, %v732_v48  ;;  %v866_v53 = vadd.f32 %v803_v49, %v802_v47 }
 0x101   : > { %v867_v55 = vadd.f32 %v866_v53, %v804_v51  ;;  %v1123_v56 = vpop.f32.mrb[4].mxu0  ;;  %v734_v57 = vadd.f32 %v1120_v43, %v733_v52 }
 0x102   : > { %674 = vst [vmem:[%s1360_s14 + $0x30] sm:$0xff] %v1123_v56  ;;  %v429_v58 = vpop.f32.mrb[5].mxu0  ;;  %v1383_v59 = vpop.f32.mrb[4].mxu1  ;;  %v808_v7 = vmul.f32 %v1123_v56, %v1123_v56 }
 0x103   : > { %672 = vst [vmem:[%s1360_s14 + $0x20] sm:$0xff] %v429_v58  ;;  %v735_v60 = vadd.f32 %v734_v57, %v429_v58  ;;  %v806_v61 = vmul.f32 %v429_v58, %v429_v58  ;;  %v868_v62 = vadd.f32 %v867_v55, %v805_v54  ;;  %v1124_v63 = vpop.f32.mrb[6].mxu0  ;;  %706 = vst [vmem:[%s1360_s14 + $0x130] sm:$0xff] %v1383_v59  ;;  %v1388_v0 = vpop.f32.mrb[5].mxu1 }
 0x104   : > { %675 = vst [vmem:[%s1360_s14 + $0x38] sm:$0xff] %v1124_v63  ;;  %v432_v1 = vpop.f32.mrb[7].mxu0  ;;  %704 = vst [vmem:[%s1360_s14 + $0x120] sm:$0xff] %v1388_v0  ;;  %v1393_v2 = vpop.f32.mrb[6].mxu1  ;;  %v809_v10 = vmul.f32 %v1124_v63, %v1124_v63 }
 0x105   : > { %v869_v3 = vadd.f32 %v868_v62, %v806_v61  ;;  %673 = vst [vmem:[%s1360_s14 + $0x28] sm:$0xff] %v432_v1  ;;  %v736_v4 = vadd.f32 %v735_v60, %v432_v1  ;;  %v807_v5 = vmul.f32 %v432_v1, %v432_v1  ;;  %707 = vst [vmem:[%s1360_s14 + $0x138] sm:$0xff] %v1393_v2  ;;  %v1398_v6 = vpop.f32.mrb[7].mxu1 }
 0x106   : > { %705 = vst [vmem:[%s1360_s14 + $0x128] sm:$0xff] %v1398_v6 }
 0x107   : > { %v737_v8 = vadd.f32 %v1123_v56, %v736_v4  ;;  %v870_v9 = vadd.f32 %v869_v3, %v807_v5 }
 0x109   : > { %v871_v11 = vadd.f32 %v870_v9, %v808_v7  ;;  %v1127_v12 = vpop.f32.mrb[8].mxu0  ;;  %v738_v13 = vadd.f32 %v1124_v63, %v737_v8 }
 0x10a   : > { %678 = vst [vmem:[%s1360_s14 + $0x50] sm:$0xff] %v1127_v12  ;;  %v445_v14 = vpop.f32.mrb[9].mxu0  ;;  %v1403_v15 = vpop.f32.mrb[8].mxu1  ;;  %v812_v27 = vmul.f32 %v1127_v12, %v1127_v12 }
 0x10b   : > { %676 = vst [vmem:[%s1360_s14 + $0x40] sm:$0xff] %v445_v14  ;;  %v739_v16 = vadd.f32 %v738_v13, %v445_v14  ;;  %v810_v17 = vmul.f32 %v445_v14, %v445_v14  ;;  %v872_v18 = vadd.f32 %v871_v11, %v809_v10  ;;  %v1128_v19 = vpop.f32.mrb[10].mxu0  ;;  %710 = vst [vmem:[%s1360_s14 + $0x150] sm:$0xff] %v1403_v15  ;;  %v1408_v20 = vpop.f32.mrb[9].mxu1 }
 0x10c   : > { %679 = vst [vmem:[%s1360_s14 + $0x58] sm:$0xff] %v1128_v19  ;;  %v448_v21 = vpop.f32.mrb[11].mxu0  ;;  %708 = vst [vmem:[%s1360_s14 + $0x140] sm:$0xff] %v1408_v20  ;;  %v1413_v22 = vpop.f32.mrb[10].mxu1  ;;  %v813_v30 = vmul.f32 %v1128_v19, %v1128_v19 }
 0x10d   : > { %v873_v23 = vadd.f32 %v872_v18, %v810_v17  ;;  %677 = vst [vmem:[%s1360_s14 + $0x48] sm:$0xff] %v448_v21  ;;  %v740_v24 = vadd.f32 %v739_v16, %v448_v21  ;;  %v811_v25 = vmul.f32 %v448_v21, %v448_v21  ;;  %711 = vst [vmem:[%s1360_s14 + $0x158] sm:$0xff] %v1413_v22  ;;  %v1418_v26 = vpop.f32.mrb[11].mxu1 }
 0x10e   : > { %709 = vst [vmem:[%s1360_s14 + $0x148] sm:$0xff] %v1418_v26 }
 0x10f   : > { %v741_v28 = vadd.f32 %v1127_v12, %v740_v24  ;;  %v874_v29 = vadd.f32 %v873_v23, %v811_v25 }
 0x111   : > { %v875_v31 = vadd.f32 %v874_v29, %v812_v27  ;;  %v1131_v32 = vpop.f32.mrb[12].mxu0  ;;  %v742_v33 = vadd.f32 %v1128_v19, %v741_v28 }
 0x112   : > { %682 = vst [vmem:[%s1360_s14 + $0x70] sm:$0xff] %v1131_v32  ;;  %v461_v34 = vpop.f32.mrb[13].mxu0  ;;  %v1423_v35 = vpop.f32.mrb[12].mxu1  ;;  %v816_v51 = vmul.f32 %v1131_v32, %v1131_v32 }
 0x113   : > { %680 = vst [vmem:[%s1360_s14 + $0x60] sm:$0xff] %v461_v34  ;;  %v743_v36 = vadd.f32 %v742_v33, %v461_v34  ;;  %v814_v37 = vmul.f32 %v461_v34, %v461_v34  ;;  %v876_v38 = vadd.f32 %v875_v31, %v813_v30  ;;  %v1132_v39 = vpop.f32.mrb[14].mxu0  ;;  %714 = vst [vmem:[%s1360_s14 + $0x170] sm:$0xff] %v1423_v35  ;;  %v1428_v40 = vpop.f32.mrb[13].mxu1 }
 0x114   : > { %683 = vst [vmem:[%s1360_s14 + $0x78] sm:$0xff] %v1132_v39  ;;  %v464_v41 = vpop.f32.mrb[15].mxu0  ;;  %712 = vst [vmem:[%s1360_s14 + $0x160] sm:$0xff] %v1428_v40  ;;  %v1433_v43 = vpop.f32.mrb[14].mxu1  ;;  %v817_v54 = vmul.f32 %v1132_v39, %v1132_v39 }
 0x115   : > { %v877_v45 = vadd.f32 %v876_v38, %v814_v37  ;;  %681 = vst [vmem:[%s1360_s14 + $0x68] sm:$0xff] %v464_v41  ;;  %v744_v47 = vadd.f32 %v743_v36, %v464_v41  ;;  %v815_v48 = vmul.f32 %v464_v41, %v464_v41  ;;  %715 = vst [vmem:[%s1360_s14 + $0x178] sm:$0xff] %v1433_v43  ;;  %v1438_v49 = vpop.f32.mrb[15].mxu1 }
 0x116   : > { %713 = vst [vmem:[%s1360_s14 + $0x168] sm:$0xff] %v1438_v49 }
 0x117   : > { %v745_v52 = vadd.f32 %v1131_v32, %v744_v47  ;;  %v878_v53 = vadd.f32 %v877_v45, %v815_v48 }
 0x119   : > { %v879_v55 = vadd.f32 %v878_v53, %v816_v51  ;;  %v1135_v56 = vpop.f32.mrb[16].mxu0  ;;  %v746_v57 = vadd.f32 %v1132_v39, %v745_v52 }
 0x11a   : > { %686 = vst [vmem:[%s1360_s14 + $0x90] sm:$0xff] %v1135_v56  ;;  %v477_v58 = vpop.f32.mrb[17].mxu0  ;;  %v1443_v60 = vpop.f32.mrb[16].mxu1  ;;  %v820_v11 = vmul.f32 %v1135_v56, %v1135_v56 }
 0x11b   : > { %684 = vst [vmem:[%s1360_s14 + $0x80] sm:$0xff] %v477_v58  ;;  %v747_v61 = vadd.f32 %v746_v57, %v477_v58  ;;  %v818_v62 = vmul.f32 %v477_v58, %v477_v58  ;;  %v880_v63 = vadd.f32 %v879_v55, %v817_v54  ;;  %v1136_v1 = vpop.f32.mrb[18].mxu0  ;;  %718 = vst [vmem:[%s1360_s14 + $0x190] sm:$0xff] %v1443_v60  ;;  %v1448_v3 = vpop.f32.mrb[17].mxu1 }
 0x11c   : > { %687 = vst [vmem:[%s1360_s14 + $0x98] sm:$0xff] %v1136_v1  ;;  %v480_v4 = vpop.f32.mrb[19].mxu0  ;;  %716 = vst [vmem:[%s1360_s14 + $0x180] sm:$0xff] %v1448_v3  ;;  %v1453_v5 = vpop.f32.mrb[18].mxu1  ;;  %v821_v14 = vmul.f32 %v1136_v1, %v1136_v1 }
 0x11d   : > { %v881_v7 = vadd.f32 %v880_v63, %v818_v62  ;;  %685 = vst [vmem:[%s1360_s14 + $0x88] sm:$0xff] %v480_v4  ;;  %v748_v8 = vadd.f32 %v747_v61, %v480_v4  ;;  %v819_v9 = vmul.f32 %v480_v4, %v480_v4  ;;  %719 = vst [vmem:[%s1360_s14 + $0x198] sm:$0xff] %v1453_v5  ;;  %v1458_v10 = vpop.f32.mrb[19].mxu1 }
 0x11e   : > { %717 = vst [vmem:[%s1360_s14 + $0x188] sm:$0xff] %v1458_v10 }
 0x11f   : > { %v749_v12 = vadd.f32 %v1135_v56, %v748_v8  ;;  %v882_v13 = vadd.f32 %v881_v7, %v819_v9 }
 0x121   : > { %v883_v16 = vadd.f32 %v882_v13, %v820_v11  ;;  %v1139_v17 = vpop.f32.mrb[20].mxu0  ;;  %v750_v18 = vadd.f32 %v1136_v1, %v749_v12 }
 0x122   : > { %690 = vst [vmem:[%s1360_s14 + $0xb0] sm:$0xff] %v1139_v17  ;;  %v493_v19 = vpop.f32.mrb[21].mxu0  ;;  %v1463_v21 = vpop.f32.mrb[20].mxu1  ;;  %v824_v36 = vmul.f32 %v1139_v17, %v1139_v17 }
 0x123   : > { %688 = vst [vmem:[%s1360_s14 + $0xa0] sm:$0xff] %v493_v19  ;;  %v751_v23 = vadd.f32 %v750_v18, %v493_v19  ;;  %v822_v24 = vmul.f32 %v493_v19, %v493_v19  ;;  %v884_v25 = vadd.f32 %v883_v16, %v821_v14  ;;  %v1140_v27 = vpop.f32.mrb[22].mxu0  ;;  %722 = vst [vmem:[%s1360_s14 + $0x1b0] sm:$0xff] %v1463_v21  ;;  %v1468_v28 = vpop.f32.mrb[21].mxu1 }
 0x124   : > { %691 = vst [vmem:[%s1360_s14 + $0xb8] sm:$0xff] %v1140_v27  ;;  %v496_v29 = vpop.f32.mrb[23].mxu0  ;;  %720 = vst [vmem:[%s1360_s14 + $0x1a0] sm:$0xff] %v1468_v28  ;;  %v1473_v30 = vpop.f32.mrb[22].mxu1  ;;  %v825_v39 = vmul.f32 %v1140_v27, %v1140_v27 }
 0x125   : > { %v885_v31 = vadd.f32 %v884_v25, %v822_v24  ;;  %689 = vst [vmem:[%s1360_s14 + $0xa8] sm:$0xff] %v496_v29  ;;  %v752_v32 = vadd.f32 %v751_v23, %v496_v29  ;;  %v823_v33 = vmul.f32 %v496_v29, %v496_v29  ;;  %723 = vst [vmem:[%s1360_s14 + $0x1b8] sm:$0xff] %v1473_v30  ;;  %v1478_v34 = vpop.f32.mrb[23].mxu1 }
 0x126   : > { %721 = vst [vmem:[%s1360_s14 + $0x1a8] sm:$0xff] %v1478_v34 }
 0x127   : > { %v753_v37 = vadd.f32 %v1139_v17, %v752_v32  ;;  %v886_v38 = vadd.f32 %v885_v31, %v823_v33 }
 0x129   : > { %v887_v41 = vadd.f32 %v886_v38, %v824_v36  ;;  %v1143_v45 = vpop.f32.mrb[24].mxu0  ;;  %v754_v47 = vadd.f32 %v1140_v27, %v753_v37 }
 0x12a   : > { %694 = vst [vmem:[%s1360_s14 + $0xd0] sm:$0xff] %v1143_v45  ;;  %v509_v48 = vpop.f32.mrb[25].mxu0  ;;  %v1483_v51 = vpop.f32.mrb[24].mxu1  ;;  %v828_v4 = vmul.f32 %v1143_v45, %v1143_v45 }
 0x12b   : > { %692 = vst [vmem:[%s1360_s14 + $0xc0] sm:$0xff] %v509_v48  ;;  %v755_v52 = vadd.f32 %v754_v47, %v509_v48  ;;  %v826_v53 = vmul.f32 %v509_v48, %v509_v48  ;;  %v888_v54 = vadd.f32 %v887_v41, %v825_v39  ;;  %v1144_v55 = vpop.f32.mrb[26].mxu0  ;;  %726 = vst [vmem:[%s1360_s14 + $0x1d0] sm:$0xff] %v1483_v51  ;;  %v1488_v56 = vpop.f32.mrb[25].mxu1 }
 0x12c   : > { %695 = vst [vmem:[%s1360_s14 + $0xd8] sm:$0xff] %v1144_v55  ;;  %v512_v57 = vpop.f32.mrb[27].mxu0  ;;  %724 = vst [vmem:[%s1360_s14 + $0x1c0] sm:$0xff] %v1488_v56  ;;  %v1493_v58 = vpop.f32.mrb[26].mxu1  ;;  %v829_v9 = vmul.f32 %v1144_v55, %v1144_v55  ;;  %v834_v47 = vmul.f32 %v1368_v44, %v1368_v44 }
 0x12d   : > { %v889_v61 = vadd.f32 %v888_v54, %v826_v53  ;;  %693 = vst [vmem:[%s1360_s14 + $0xc8] sm:$0xff] %v512_v57  ;;  %v756_v62 = vadd.f32 %v755_v52, %v512_v57  ;;  %v827_v63 = vmul.f32 %v512_v57, %v512_v57  ;;  %727 = vst [vmem:[%s1360_s14 + $0x1d8] sm:$0xff] %v1493_v58  ;;  %v1498_v1 = vpop.f32.mrb[27].mxu1 }
 0x12e   : > { %725 = vst [vmem:[%s1360_s14 + $0x1c8] sm:$0xff] %v1498_v1  ;;  %v836_v57 = vmul.f32 %v1363_v42, %v1363_v42 }
 0x12f   : > { %v757_v7 = vadd.f32 %v1143_v45, %v756_v62  ;;  %v890_v8 = vadd.f32 %v889_v61, %v827_v63  ;;  %v837_v63 = vmul.f32 %v1373_v46, %v1373_v46 }
 0x131   : > { %v891_v11 = vadd.f32 %v890_v8, %v828_v4  ;;  %v1147_v12 = vpop.f32.mrb[28].mxu0  ;;  %v758_v13 = vadd.f32 %v1144_v55, %v757_v7  ;;  %v835_v55 = vmul.f32 %v1378_v50, %v1378_v50 }
 0x132   : > { %698 = vst [vmem:[%s1360_s14 + $0xf0] sm:$0xff] %v1147_v12  ;;  %v525_v14 = vpop.f32.mrb[29].mxu0  ;;  %v1503_v16 = vpop.f32.mrb[28].mxu1  ;;  %v832_v36 = vmul.f32 %v1147_v12, %v1147_v12 }
 0x133   : > { %696 = vst [vmem:[%s1360_s14 + $0xe0] sm:$0xff] %v525_v14  ;;  %v759_v17 = vadd.f32 %v758_v13, %v525_v14  ;;  %v830_v18 = vmul.f32 %v525_v14, %v525_v14  ;;  %v892_v19 = vadd.f32 %v891_v11, %v829_v9  ;;  %v1148_v23 = vpop.f32.mrb[30].mxu0  ;;  %730 = vst [vmem:[%s1360_s14 + $0x1f0] sm:$0xff] %v1503_v16  ;;  %v1508_v24 = vpop.f32.mrb[29].mxu1 }
 0x134   : > { %699 = vst [vmem:[%s1360_s14 + $0xf8] sm:$0xff] %v1148_v23  ;;  %v528_v25 = vpop.f32.mrb[31].mxu0  ;;  %728 = vst [vmem:[%s1360_s14 + $0x1e0] sm:$0xff] %v1508_v24  ;;  %v1513_v27 = vpop.f32.mrb[30].mxu1  ;;  %v833_v39 = vmul.f32 %v1148_v23, %v1148_v23 }
 0x135   : > { %v893_v29 = vadd.f32 %v892_v19, %v830_v18  ;;  %697 = vst [vmem:[%s1360_s14 + $0xe8] sm:$0xff] %v528_v25  ;;  %v760_v31 = vadd.f32 %v759_v17, %v528_v25  ;;  %v831_v32 = vmul.f32 %v528_v25, %v528_v25  ;;  %731 = vst [vmem:[%s1360_s14 + $0x1f8] sm:$0xff] %v1513_v27  ;;  %v1518_v33 = vpop.f32.mrb[31].mxu1 }
 0x136   : > { %729 = vst [vmem:[%s1360_s14 + $0x1e8] sm:$0xff] %v1518_v33 }
 0x137   : > { %v761_v37 = vadd.f32 %v1147_v12, %v760_v31  ;;  %v894_v38 = vadd.f32 %v893_v29, %v831_v32  ;;  %v839_v12 = vmul.f32 %v1398_v6, %v1398_v6  ;;  %v843_v29 = vmul.f32 %v1418_v26, %v1418_v26 }
 0x139   : > { %v895_v41 = vadd.f32 %v894_v38, %v832_v36  ;;  %v762_v45 = vadd.f32 %v1148_v23, %v761_v37 }
 0x13b   : > { %v763_v48 = vadd.f32 %v762_v45, %v1368_v44  ;;  %v896_v52 = vadd.f32 %v895_v41, %v833_v39  ;;  %v838_v44 = vmul.f32 %v1388_v0, %v1388_v0  ;;  %v847_v45 = vmul.f32 %v1438_v49, %v1438_v49 }
 0x13d   : > { %v897_v53 = vadd.f32 %v896_v52, %v834_v47  ;;  %v764_v54 = vadd.f32 %v763_v48, %v1378_v50 }
 0x13f   : > { %v765_v61 = vadd.f32 %v1363_v42, %v764_v54  ;;  %v898_v62 = vadd.f32 %v897_v53, %v835_v55  ;;  %v840_v42 = vmul.f32 %v1383_v59, %v1383_v59 }
 0x141   : > { %v899_v4 = vadd.f32 %v898_v62, %v836_v57  ;;  %v766_v7 = vadd.f32 %v1373_v46, %v765_v61  ;;  %v841_v46 = vmul.f32 %v1393_v2, %v1393_v2  ;;  %v851_v61 = vmul.f32 %v1458_v10, %v1458_v10 }
 0x143   : > { %v767_v8 = vadd.f32 %v766_v7, %v1388_v0  ;;  %v900_v9 = vadd.f32 %v899_v4, %v837_v63  ;;  %v842_v0 = vmul.f32 %v1408_v20, %v1408_v20 }
 0x145   : > { %v901_v11 = vadd.f32 %v900_v9, %v838_v44  ;;  %v768_v50 = vadd.f32 %v767_v8, %v1398_v6 }
 0x147   : > { %v769_v13 = vadd.f32 %v1383_v59, %v768_v50  ;;  %v902_v14 = vadd.f32 %v901_v11, %v839_v12  ;;  %v844_v59 = vmul.f32 %v1403_v15, %v1403_v15  ;;  %v855_v11 = vmul.f32 %v1478_v34, %v1478_v34 }
 0x149   : > { %v903_v17 = vadd.f32 %v902_v14, %v840_v42  ;;  %v770_v18 = vadd.f32 %v1393_v2, %v769_v13  ;;  %v845_v2 = vmul.f32 %v1413_v22, %v1413_v22 }
 0x14b   : > { %v771_v19 = vadd.f32 %v770_v18, %v1408_v20  ;;  %v904_v23 = vadd.f32 %v903_v17, %v841_v46  ;;  %v846_v20 = vmul.f32 %v1428_v40, %v1428_v40  ;;  %v859_v18 = vmul.f32 %v1498_v1, %v1498_v1 }
 0x14d   : > { %v905_v25 = vadd.f32 %v904_v23, %v842_v0  ;;  %v772_v6 = vadd.f32 %v771_v19, %v1418_v26 }
 0x14f   : > { %v773_v31 = vadd.f32 %v1403_v15, %v772_v6  ;;  %v906_v32 = vadd.f32 %v905_v25, %v843_v29  ;;  %v848_v15 = vmul.f32 %v1423_v35, %v1423_v35  ;;  %v862_v25 = vmul.f32 %v1508_v24, %v1508_v24 }
 0x151   : > { %v907_v36 = vadd.f32 %v906_v32, %v844_v59  ;;  %v774_v37 = vadd.f32 %v1413_v22, %v773_v31  ;;  %v849_v22 = vmul.f32 %v1433_v43, %v1433_v43  ;;  %v864_v31 = vmul.f32 %v1503_v16, %v1503_v16 }
 0x153   : > { %v775_v38 = vadd.f32 %v774_v37, %v1428_v40  ;;  %v908_v39 = vadd.f32 %v907_v36, %v845_v2  ;;  %v850_v40 = vmul.f32 %v1448_v3, %v1448_v3 }
 0x155   : > { %v909_v41 = vadd.f32 %v908_v39, %v846_v20  ;;  %v776_v26 = vadd.f32 %v775_v38, %v1438_v49 }
 0x157   : > { %v777_v47 = vadd.f32 %v1423_v35, %v776_v26  ;;  %v910_v48 = vadd.f32 %v909_v41, %v847_v45  ;;  %v852_v35 = vmul.f32 %v1443_v60, %v1443_v60 }
 0x159   : > { %v911_v52 = vadd.f32 %v910_v48, %v848_v15  ;;  %v778_v53 = vadd.f32 %v1433_v43, %v777_v47  ;;  %v853_v43 = vmul.f32 %v1453_v5, %v1453_v5 }
 0x15b   : > { %v779_v54 = vadd.f32 %v778_v53, %v1448_v3  ;;  %v912_v55 = vadd.f32 %v911_v52, %v849_v22  ;;  %v854_v3 = vmul.f32 %v1468_v28, %v1468_v28 }
 0x15d   : > { %v913_v57 = vadd.f32 %v912_v55, %v850_v40  ;;  %v780_v49 = vadd.f32 %v779_v54, %v1458_v10 }
 0x15f   : > { %v781_v62 = vadd.f32 %v1443_v60, %v780_v49  ;;  %v914_v63 = vadd.f32 %v913_v57, %v851_v61  ;;  %v856_v60 = vmul.f32 %v1463_v21, %v1463_v21 }
 0x161   : > { %v915_v4 = vadd.f32 %v914_v63, %v852_v35  ;;  %v782_v7 = vadd.f32 %v1453_v5, %v781_v62  ;;  %v857_v5 = vmul.f32 %v1473_v30, %v1473_v30 }
 0x163   : > { %v783_v44 = vadd.f32 %v782_v7, %v1468_v28  ;;  %v916_v8 = vadd.f32 %v915_v4, %v853_v43  ;;  %v858_v28 = vmul.f32 %v1488_v56, %v1488_v56 }
 0x165   : > { %v917_v9 = vadd.f32 %v916_v8, %v854_v3  ;;  %v784_v10 = vadd.f32 %v783_v44, %v1478_v34 }
 0x167   : > { %v785_v50 = vadd.f32 %v1463_v21, %v784_v10  ;;  %v918_v12 = vadd.f32 %v917_v9, %v855_v11  ;;  %v860_v21 = vmul.f32 %v1483_v51, %v1483_v51 }
 0x169   : > { %v919_v42 = vadd.f32 %v918_v12, %v856_v60  ;;  %v786_v13 = vadd.f32 %v1473_v30, %v785_v50  ;;  %v861_v30 = vmul.f32 %v1493_v58, %v1493_v58 }
 0x16b   : > { %v787_v14 = vadd.f32 %v786_v13, %v1488_v56  ;;  %v920_v46 = vadd.f32 %v919_v42, %v857_v5 }
 0x16d   : > { %v921_v17 = vadd.f32 %v920_v46, %v858_v28  ;;  %v788_v34 = vadd.f32 %v787_v14, %v1498_v1 }
 0x16f   : > { %v789_v0 = vadd.f32 %v1483_v51, %v788_v34  ;;  %v922_v19 = vadd.f32 %v921_v17, %v859_v18  ;;  %v863_v51 = vmul.f32 %v1518_v33, %v1518_v33 }
 0x171   : > { %v923_v23 = vadd.f32 %v922_v19, %v860_v21  ;;  %v790_v56 = vadd.f32 %v1493_v58, %v789_v0  ;;  %v865_v58 = vmul.f32 %v1513_v27, %v1513_v27 }
 0x173   : > { %v791_v6 = vadd.f32 %v790_v56, %v1508_v24  ;;  %v924_v29 = vadd.f32 %v923_v23, %v861_v30 }
 0x175   : > { %v925_v1 = vadd.f32 %v924_v29, %v862_v25  ;;  %v792_v59 = vadd.f32 %v791_v6, %v1518_v33 }
 0x177   : > { %v793_v32 = vadd.f32 %v1503_v16, %v792_v59  ;;  %v926_v2 = vadd.f32 %v925_v1, %v863_v51 }
 0x179   : > { %v794_v36 = vadd.f32 %v1513_v27, %v793_v32  ;;  %v927_v24 = vadd.f32 %v926_v2, %v864_v31 }
 0x17b   : > { %v795_v37 = vrot.slane %v794_v36, 4  ;;  %v928_v20 = vadd.f32 %v927_v24, %v865_v58 }
 0x17d   : > { %v796_v38 = vadd.f32 %v795_v37, %v794_v36  ;;  %v929_v39 = vrot.slane %v928_v20, 4 }
 0x17f   : > { %v797_v41 = vrot.slane %v796_v38, 2  ;;  %v930_v26 = vadd.f32 %v929_v39, %v928_v20 }
 0x181   : > { %v798_v33 = vadd.f32 %v797_v41, %v796_v38  ;;  %v931_v45 = vrot.slane %v930_v26, 2 }
 0x183   : > { %v799_v15 = vrot.slane %v798_v33, 1  ;;  %v932_v47 = vadd.f32 %v931_v45, %v930_v26 }
 0x185   : > { %v800_v16 = vadd.f32 %v799_v15, %v798_v33  ;;  %v933_v48 = vrot.slane %v932_v47, 1 }
 0x187   : > { %801 = vst [vmem:[%s214_s19] sm:$0x1] %v800_v16  ;;  %v934_v27 = vadd.f32 %v933_v48, %v932_v47 }
 0x189   : > { %935 = vst [vmem:[%s217_s22] sm:$0x1] %v934_v27 }
 0x18a PF: > { %s15_s15 = sadd.s32 1, %s1219_s15  }
 0x18b   : > { %p12_p5 = scmp.ge.s32.totalorder %s15_s15, 10  }
 0x18d   :  { %14 = sbr.rel (!%p12_p5) target bundleno = 1 (0x1), region = 82 }

</bundles_post_ra>
